<compile_context>
chip_gen: v5e
topology: v5e:2x2
jax: 0.10.0
libtpu: 0.0.40
codegen_flags: <defaults>
</compile_context>

<pallas_src>
import functools

import jax
import jax.numpy as jnp
from jax.experimental import pallas as pl
from jax.experimental.pallas import tpu as pltpu

INPUT_SIZE = 5
INPUT_PAD = 8          # MXU-aligned contraction dim for layer 1 (zero-padded)
HIDDEN_SIZE = 128
OUTPUT_SIZE = 2
BN_EPS = 1e-5
NEG_SLOPE = 0.01

# Batch tile: big enough that per-step compute dwarfs the ~0.35 us grid-step
# overhead.  bf16 weights are ~34 KiB resident; (tile_b, 128) f32 temporaries
# at 2048 rows are 1 MiB each -> total well under the 32 MiB scoped-VMEM ask
# (and under v7x's 64 MiB physical VMEM).
DEFAULT_TILE_B = 2048
VMEM_LIMIT_BYTES = 32 * 1024 * 1024


def _leaky_relu(x):
    # max(x, a*x) == leaky_relu(x) for 0 < a < 1.  Stays in f32 (v5e-safe).
    return jnp.maximum(x, NEG_SLOPE * x)


def _mlp_kernel(
    x_ref,
    w1_ref, t1_ref,
    w2_ref, t2_ref,
    w3_ref, t3_ref,
    w4_ref, b4_ref,
    out_ref,
):
    """Fused forward: 3x (matmul -> +shift -> leaky_relu) + final linear.

    Weights hold the folded BN scale (bf16 by default); shifts/bias rows are
    f32; all MXU accumulation and elementwise math happens in f32.
    """
    cdt = w2_ref.dtype  # compute dtype for MXU inputs (bf16 default, or f32)

    h = jnp.dot(x_ref[...], w1_ref[...], preferred_element_type=jnp.float32)
    h = _leaky_relu(h + t1_ref[...])

    h = jnp.dot(h.astype(cdt), w2_ref[...], preferred_element_type=jnp.float32)
    h = _leaky_relu(h + t2_ref[...])

    h = jnp.dot(h.astype(cdt), w3_ref[...], preferred_element_type=jnp.float32)
    h = _leaky_relu(h + t3_ref[...])

    y = jnp.dot(h.astype(cdt), w4_ref[...], preferred_element_type=jnp.float32)
    out_ref[...] = (y + b4_ref[...]).astype(out_ref.dtype)


def prepare_params(params, compute_dtype=jnp.bfloat16):
    """One-time fold of Linear bias + BatchNorm1d (running stats) into the
    weights (scale) and per-feature f32 shift rows.  Call once at param load.

    bf16 by default (native MXU dtype on v5e/v6e/v7x); pass jnp.float32 for a
    tight-tolerance path."""

    def fold(w, b, gamma, beta, mean, var):
        scale = gamma / jnp.sqrt(var + BN_EPS)               # (F,)
        w_sc = (w * scale[None, :]).astype(compute_dtype)    # (Fin, Fout)
        shift = ((b - mean) * scale + beta).reshape(1, -1)   # (1, Fout)
        return w_sc, shift.astype(jnp.float32)

    w1, t1 = fold(params["w1"], params["b1"], params["g1"], params["be1"],
                  params["m1"], params["v1"])
    # Zero-pad K: 5 -> 8 so the first MXU push has an aligned (8, 128) RHS.
    w1 = jnp.pad(w1, ((0, INPUT_PAD - INPUT_SIZE), (0, 0)))
    w2, t2 = fold(params["w2"], params["b2"], params["g2"], params["be2"],
                  params["m2"], params["v2"])
    w3, t3 = fold(params["w3"], params["b3"], params["g3"], params["be3"],
                  params["m3"], params["v3"])
    w4 = params["w4"].astype(compute_dtype)
    b4 = params["b4"].reshape(1, -1).astype(jnp.float32)

    return dict(w1=w1, t1=t1, w2=w2, t2=t2, w3=w3, t3=t3, w4=w4, b4=b4)


def _round_up(n, m):
    return ((n + m - 1) // m) * m


@jax.jit
def enemy_movement_forward(x, prepped):
    """x: (B, INPUT_SIZE) -> (B, OUTPUT_SIZE) float32.  Eval-mode forward."""
    B = x.shape[0]
    compute_dtype = prepped["w2"].dtype

    # Cast + feature-pad (5 -> 8) fuse into one tiny pass over x in XLA.
    x = jnp.pad(x.astype(compute_dtype),
                ((0, 0), (0, INPUT_PAD - INPUT_SIZE)))

    # Batch tile: sublane-aligned, clamped for small batches.
    tile_b = min(DEFAULT_TILE_B, _round_up(max(B, 1), 8))
    # Guarantee >= 2 grid steps when the batch allows it so the "parallel"
    # batch axis can shard across both v7x TensorCores (no-op on v5e/v6e).
    if B >= 16 and pl.cdiv(B, tile_b) < 2:
        tile_b = _round_up(pl.cdiv(B, 2), 8)
    grid = (pl.cdiv(B, tile_b),)   # ragged tail handled by Pallas edge blocks

    def const_spec(shape):
        # Whole array as one block, same block every step -> VMEM-resident.
        return pl.BlockSpec(shape, lambda i: (0,) * len(shape))

    in_specs = [
        pl.BlockSpec((tile_b, INPUT_PAD), lambda i: (i, 0)),   # x tile
        const_spec((INPUT_PAD, HIDDEN_SIZE)),                  # w1 (K padded)
        const_spec((1, HIDDEN_SIZE)),                          # t1
        const_spec((HIDDEN_SIZE, HIDDEN_SIZE)),                # w2
        const_spec((1, HIDDEN_SIZE)),                          # t2
        const_spec((HIDDEN_SIZE, HIDDEN_SIZE)),                # w3
        const_spec((1, HIDDEN_SIZE)),                          # t3
        const_spec((HIDDEN_SIZE, OUTPUT_SIZE)),                # w4
        const_spec((1, OUTPUT_SIZE)),                          # b4
    ]
    out_spec = pl.BlockSpec((tile_b, OUTPUT_SIZE), lambda i: (i, 0))

    return pl.pallas_call(
        _mlp_kernel,
        out_shape=jax.ShapeDtypeStruct((B, OUTPUT_SIZE), jnp.float32),
        grid=grid,
        in_specs=in_specs,
        out_specs=out_spec,
        compiler_params=pltpu.CompilerParams(
            # PARALLEL is the portable megacore hint; CORE_PARALLEL is a
            # possible v7x-specific follow-up once measured on hardware.
            dimension_semantics=(pltpu.PARALLEL,),
            vmem_limit_bytes=VMEM_LIMIT_BYTES,
        ),
    )(
        x,
        prepped["w1"], prepped["t1"],
        prepped["w2"], prepped["t2"],
        prepped["w3"], prepped["t3"],
        prepped["w4"], prepped["b4"],
    )


def init_params(key):
    """Deterministic synthetic parameters, PyTorch-style uniform(+-1/sqrt(fan_in))."""
    keys = jax.random.split(key, 16)

    def linear(kw, kb, fan_in, fan_out):
        bound = 1.0 / jnp.sqrt(jnp.float32(fan_in))
        # stored as (in, out) so the kernel does x @ W
        w = jax.random.uniform(kw, (fan_in, fan_out), jnp.float32, -bound, bound)
        b = jax.random.uniform(kb, (fan_out,), jnp.float32, -bound, bound)
        return w, b

    w1, b1 = linear(keys[0], keys[1], INPUT_SIZE, HIDDEN_SIZE)
    w2, b2 = linear(keys[2], keys[3], HIDDEN_SIZE, HIDDEN_SIZE)
    w3, b3 = linear(keys[4], keys[5], HIDDEN_SIZE, HIDDEN_SIZE)
    w4, b4 = linear(keys[6], keys[7], HIDDEN_SIZE, OUTPUT_SIZE)

    def bn(kg, kb, kr, n):
        gamma = 1.0 + 0.1 * jax.random.normal(kg, (n,), jnp.float32)
        beta = 0.1 * jax.random.normal(kb, (n,), jnp.float32)
        mean = 0.05 * jax.random.normal(kr, (n,), jnp.float32)
        var = jnp.ones((n,), jnp.float32) * 1.2
        return gamma, beta, mean, var

    g1, be1, m1, v1 = bn(keys[8], keys[9], keys[10], HIDDEN_SIZE)
    g2, be2, m2, v2 = bn(keys[11], keys[12], keys[13], HIDDEN_SIZE)
    g3, be3, m3, v3 = bn(keys[14], keys[15], keys[8], HIDDEN_SIZE)

    return dict(
        w1=w1, b1=b1, w2=w2, b2=b2, w3=w3, b3=b3, w4=w4, b4=b4,
        g1=g1, be1=be1, m1=m1, v1=v1,
        g2=g2, be2=be2, m2=m2, v2=v2,
        g3=g3, be3=be3, m3=m3, v3=v3,
    )


def reference_forward(x, params):
    """Pure-JAX reference (same eval-mode semantics as the PyTorch module)."""
    def block(h, w, b, g, be, m, v):
        h = h @ w + b
        h = (h - m) / jnp.sqrt(v + BN_EPS) * g + be
        return jnp.where(h > 0, h, NEG_SLOPE * h)

    h = block(x, params["w1"], params["b1"], params["g1"], params["be1"],
              params["m1"], params["v1"])
    h = block(h, params["w2"], params["b2"], params["g2"], params["be2"],
              params["m2"], params["v2"])
    h = block(h, params["w3"], params["b3"], params["g3"], params["be3"],
              params["m3"], params["v3"])
    return h @ params["w4"] + params["b4"]


if __name__ == "__main__":
    key = jax.random.PRNGKey(0)
    k_param, k_x1, k_x2 = jax.random.split(key, 3)

    params = init_params(k_param)

    # --- f32 compute path: tight tolerance --------------------------------
    prepped_f32 = prepare_params(params, compute_dtype=jnp.float32)

    x_small = jax.random.normal(k_x1, (8, INPUT_SIZE), jnp.float32)
    out_small = jax.block_until_ready(enemy_movement_forward(x_small, prepped_f32))
    ref_small = reference_forward(x_small, params)
    assert out_small.shape == (8, OUTPUT_SIZE)
    assert jnp.allclose(out_small, ref_small, atol=1e-4, rtol=1e-4), (
        f"f32 small: max abs diff {jnp.max(jnp.abs(out_small - ref_small))}")

    # Batch not divisible by 8 -> exercises the ragged-tail + 2-step grid path.
    x_odd = jax.random.normal(k_x2, (37, INPUT_SIZE), jnp.float32)
    out_odd = jax.block_until_ready(enemy_movement_forward(x_odd, prepped_f32))
    ref_odd = reference_forward(x_odd, params)
    assert out_odd.shape == (37, OUTPUT_SIZE)
    assert jnp.allclose(out_odd, ref_odd, atol=1e-4, rtol=1e-4), (
        f"f32 odd: max abs diff {jnp.max(jnp.abs(out_odd - ref_odd))}")

    # --- bf16 compute path (production default): loose tolerance ----------
    prepped_bf16 = prepare_params(params)   # bf16 weights, f32 accumulation
    out_bf16 = jax.block_until_ready(enemy_movement_forward(x_odd, prepped_bf16))
    assert out_bf16.shape == (37, OUTPUT_SIZE)
    assert jnp.allclose(out_bf16, ref_odd, atol=3e-2, rtol=3e-2), (
        f"bf16 odd: max abs diff {jnp.max(jnp.abs(out_bf16 - ref_odd))}")

    print("KERNEL_OK")
</pallas_src>

<mosaic_0001>
module attributes {stable_mosaic.version = 11 : i64} {
  func.func @_mlp_kernel(%arg0: i32, %arg1: memref<8x8xf32, #tpu.memory_space<vmem>>, %arg2: memref<8x128xf32, #tpu.memory_space<vmem>>, %arg3: memref<1x128xf32, #tpu.memory_space<vmem>>, %arg4: memref<128x128xf32, #tpu.memory_space<vmem>>, %arg5: memref<1x128xf32, #tpu.memory_space<vmem>>, %arg6: memref<128x128xf32, #tpu.memory_space<vmem>>, %arg7: memref<1x128xf32, #tpu.memory_space<vmem>>, %arg8: memref<128x2xf32, #tpu.memory_space<vmem>>, %arg9: memref<1x2xf32, #tpu.memory_space<vmem>>, %arg10: memref<8x2xf32, #tpu.memory_space<vmem>>) attributes {dimension_semantics = [#tpu.dimension_semantics<parallel>], iteration_bounds = array<i64: 1>, scalar_prefetch = 0 : i64, scratch_operands = 0 : i64, tpu.core_type = #tpu.core_type<tc>, window_params = [{transform_indices = @transform_0, window_bounds = array<i64: 8, 8>}, {pipeline_mode = #tpu.pipeline_mode<synchronous>, transform_indices = @transform_1, window_bounds = array<i64: 8, 128>}, {pipeline_mode = #tpu.pipeline_mode<synchronous>, transform_indices = @transform_2, window_bounds = array<i64: 1, 128>}, {pipeline_mode = #tpu.pipeline_mode<synchronous>, transform_indices = @transform_3, window_bounds = array<i64: 128, 128>}, {pipeline_mode = #tpu.pipeline_mode<synchronous>, transform_indices = @transform_4, window_bounds = array<i64: 1, 128>}, {pipeline_mode = #tpu.pipeline_mode<synchronous>, transform_indices = @transform_5, window_bounds = array<i64: 128, 128>}, {pipeline_mode = #tpu.pipeline_mode<synchronous>, transform_indices = @transform_6, window_bounds = array<i64: 1, 128>}, {pipeline_mode = #tpu.pipeline_mode<synchronous>, transform_indices = @transform_7, window_bounds = array<i64: 128, 2>}, {pipeline_mode = #tpu.pipeline_mode<synchronous>, transform_indices = @transform_8, window_bounds = array<i64: 1, 2>}, {transform_indices = @transform_9, window_bounds = array<i64: 8, 2>}]} {
    %c0 = arith.constant 0 : index
    %c0_0 = arith.constant 0 : index
    %0 = vector.load %arg1[%c0, %c0_0] : memref<8x8xf32, #tpu.memory_space<vmem>>, vector<8x8xf32>
    %c0_1 = arith.constant 0 : index
    %c0_2 = arith.constant 0 : index
    %1 = vector.load %arg2[%c0_1, %c0_2] : memref<8x128xf32, #tpu.memory_space<vmem>>, vector<8x128xf32>
    %cst = arith.constant dense<0.000000e+00> : vector<8x128xf32>
    %2 = tpu.matmul %0, %1, %cst {dimension_numbers = #tpu.dot_dimension_numbers<[1], [0], [0], [1], [0, 0, 1, 1], [], []>} : vector<8x8xf32>, vector<8x128xf32>, vector<8x128xf32> -> vector<8x128xf32>
    %c0_3 = arith.constant 0 : index
    %c0_4 = arith.constant 0 : index
    %3 = vector.load %arg3[%c0_3, %c0_4] : memref<1x128xf32, #tpu.memory_space<vmem>>, vector<1x128xf32>
    %4 = vector.broadcast %3 : vector<1x128xf32> to vector<8x128xf32>
    %5 = arith.addf %2, %4 : vector<8x128xf32>
    %cst_5 = arith.constant 0.00999999977 : f32
    %6 = vector.broadcast %cst_5 : f32 to vector<8x128xf32>
    %7 = arith.mulf %6, %5 : vector<8x128xf32>
    %8 = arith.maximumf %5, %7 : vector<8x128xf32>
    %c0_6 = arith.constant 0 : index
    %c0_7 = arith.constant 0 : index
    %9 = vector.load %arg4[%c0_6, %c0_7] : memref<128x128xf32, #tpu.memory_space<vmem>>, vector<128x128xf32>
    %cst_8 = arith.constant dense<0.000000e+00> : vector<8x128xf32>
    %10 = tpu.matmul %8, %9, %cst_8 {dimension_numbers = #tpu.dot_dimension_numbers<[1], [0], [0], [1], [0, 0, 1, 1], [], []>} : vector<8x128xf32>, vector<128x128xf32>, vector<8x128xf32> -> vector<8x128xf32>
    %c0_9 = arith.constant 0 : index
    %c0_10 = arith.constant 0 : index
    %11 = vector.load %arg5[%c0_9, %c0_10] : memref<1x128xf32, #tpu.memory_space<vmem>>, vector<1x128xf32>
    %12 = vector.broadcast %11 : vector<1x128xf32> to vector<8x128xf32>
    %13 = arith.addf %10, %12 : vector<8x128xf32>
    %cst_11 = arith.constant 0.00999999977 : f32
    %14 = vector.broadcast %cst_11 : f32 to vector<8x128xf32>
    %15 = arith.mulf %14, %13 : vector<8x128xf32>
    %16 = arith.maximumf %13, %15 : vector<8x128xf32>
    %c0_12 = arith.constant 0 : index
    %c0_13 = arith.constant 0 : index
    %17 = vector.load %arg6[%c0_12, %c0_13] : memref<128x128xf32, #tpu.memory_space<vmem>>, vector<128x128xf32>
    %cst_14 = arith.constant dense<0.000000e+00> : vector<8x128xf32>
    %18 = tpu.matmul %16, %17, %cst_14 {dimension_numbers = #tpu.dot_dimension_numbers<[1], [0], [0], [1], [0, 0, 1, 1], [], []>} : vector<8x128xf32>, vector<128x128xf32>, vector<8x128xf32> -> vector<8x128xf32>
    %c0_15 = arith.constant 0 : index
    %c0_16 = arith.constant 0 : index
    %19 = vector.load %arg7[%c0_15, %c0_16] : memref<1x128xf32, #tpu.memory_space<vmem>>, vector<1x128xf32>
    %20 = vector.broadcast %19 : vector<1x128xf32> to vector<8x128xf32>
    %21 = arith.addf %18, %20 : vector<8x128xf32>
    %cst_17 = arith.constant 0.00999999977 : f32
    %22 = vector.broadcast %cst_17 : f32 to vector<8x128xf32>
    %23 = arith.mulf %22, %21 : vector<8x128xf32>
    %24 = arith.maximumf %21, %23 : vector<8x128xf32>
    %c0_18 = arith.constant 0 : index
    %c0_19 = arith.constant 0 : index
    %25 = vector.load %arg8[%c0_18, %c0_19] : memref<128x2xf32, #tpu.memory_space<vmem>>, vector<128x2xf32>
    %cst_20 = arith.constant dense<0.000000e+00> : vector<8x2xf32>
    %26 = tpu.matmul %24, %25, %cst_20 {dimension_numbers = #tpu.dot_dimension_numbers<[1], [0], [0], [1], [0, 0, 1, 1], [], []>} : vector<8x128xf32>, vector<128x2xf32>, vector<8x2xf32> -> vector<8x2xf32>
    %c0_21 = arith.constant 0 : index
    %c0_22 = arith.constant 0 : index
    %27 = vector.load %arg9[%c0_21, %c0_22] : memref<1x2xf32, #tpu.memory_space<vmem>>, vector<1x2xf32>
    %28 = vector.broadcast %27 : vector<1x2xf32> to vector<8x2xf32>
    %29 = arith.addf %26, %28 : vector<8x2xf32>
    %c0_23 = arith.constant 0 : index
    %c0_24 = arith.constant 0 : index
    %30 = vector.load %arg10[%c0_23, %c0_24] : memref<8x2xf32, #tpu.memory_space<vmem>>, vector<8x2xf32>
    tpu.vector_store %arg10[%c0_23, %c0_24], %29 {strides = array<i32>} : memref<8x2xf32, #tpu.memory_space<vmem>>, vector<8x2xf32>,
    return
  }
  func.func @transform_0(%arg0: i32) -> (i32, i32) {
    %c0_i32 = arith.constant 0 : i32
    %c0_i32_0 = arith.constant 0 : i32
    return %arg0, %c0_i32 : i32, i32
  }
  func.func @transform_1(%arg0: i32) -> (i32, i32) {
    %c0_i32 = arith.constant 0 : i32
    %c0_i32_0 = arith.constant 0 : i32
    %c0_i32_1 = arith.constant 0 : i32
    return %c0_i32, %c0_i32_0 : i32, i32
  }
  func.func @transform_2(%arg0: i32) -> (i32, i32) {
    %c0_i32 = arith.constant 0 : i32
    %c0_i32_0 = arith.constant 0 : i32
    %c0_i32_1 = arith.constant 0 : i32
    return %c0_i32, %c0_i32_0 : i32, i32
  }
  func.func @transform_3(%arg0: i32) -> (i32, i32) {
    %c0_i32 = arith.constant 0 : i32
    %c0_i32_0 = arith.constant 0 : i32
    %c0_i32_1 = arith.constant 0 : i32
    return %c0_i32, %c0_i32_0 : i32, i32
  }
  func.func @transform_4(%arg0: i32) -> (i32, i32) {
    %c0_i32 = arith.constant 0 : i32
    %c0_i32_0 = arith.constant 0 : i32
    %c0_i32_1 = arith.constant 0 : i32
    return %c0_i32, %c0_i32_0 : i32, i32
  }
  func.func @transform_5(%arg0: i32) -> (i32, i32) {
    %c0_i32 = arith.constant 0 : i32
    %c0_i32_0 = arith.constant 0 : i32
    %c0_i32_1 = arith.constant 0 : i32
    return %c0_i32, %c0_i32_0 : i32, i32
  }
  func.func @transform_6(%arg0: i32) -> (i32, i32) {
    %c0_i32 = arith.constant 0 : i32
    %c0_i32_0 = arith.constant 0 : i32
    %c0_i32_1 = arith.constant 0 : i32
    return %c0_i32, %c0_i32_0 : i32, i32
  }
  func.func @transform_7(%arg0: i32) -> (i32, i32) {
    %c0_i32 = arith.constant 0 : i32
    %c0_i32_0 = arith.constant 0 : i32
    %c0_i32_1 = arith.constant 0 : i32
    return %c0_i32, %c0_i32_0 : i32, i32
  }
  func.func @transform_8(%arg0: i32) -> (i32, i32) {
    %c0_i32 = arith.constant 0 : i32
    %c0_i32_0 = arith.constant 0 : i32
    %c0_i32_1 = arith.constant 0 : i32
    return %c0_i32, %c0_i32_0 : i32, i32
  }
  func.func @transform_9(%arg0: i32) -> (i32, i32) {
    %c0_i32 = arith.constant 0 : i32
    %c0_i32_0 = arith.constant 0 : i32
    return %arg0, %c0_i32 : i32, i32
  }
}

</mosaic_0001>

<bundles_post_ra>
// kernel: enemy_movement_forward.1
= control target key start
LH: loop header
LB: loop body
LE: loop exit
PB: predicated region body
PF: predicated region fallthrough
CT: control target
= control target key end

     0   :  { %14 = vsyncpa [#allocation3], 0  ;;  %s245_s12 = smov [#allocation2]   ;;  %s246_s14 = smov 128   ;;  %s418_s0 = inlined_call_operand.vmem [shape: f32[8,8], index: 0, kind: input, shape index: {}]   ;;  %s419_s1 = inlined_call_operand.vmem [shape: f32[8,128], index: 1, kind: input, shape index: {}]   ;;  %s420_s2 = inlined_call_operand.vmem [shape: f32[1,128], index: 2, kind: input, shape index: {}]   ;;  %s421_s3 = inlined_call_operand.vmem [shape: f32[128,128], index: 3, kind: input, shape index: {}]   ;;  %s422_s4 = inlined_call_operand.vmem [shape: f32[1,128], index: 4, kind: input, shape index: {}]   ;;  %s423_s5 = inlined_call_operand.hbm [shape: f32[128,128], index: 5, kind: input, shape index: {}]   ;;  %s424_s6 = inlined_call_operand.vmem [shape: f32[1,128], index: 6, kind: input, shape index: {}]   ;;  %s425_s7 = inlined_call_operand.vmem [shape: f32[128,2], index: 7, kind: input, shape index: {}]   ;;  %s426_s8 = inlined_call_operand.vmem [shape: f32[1,2], index: 8, kind: input, shape index: {}]   ;;  %s427_s9 = inlined_call_operand.vmem [shape: f32[8,2], index: 9, kind: output, shape index: {}]  }
   0x1   :  { %s29_s11 = sshll.u32 %s423_s5, 4  ;;  %s31_s13 = sshll.u32 %s245_s12, 4  ;;  %s30_s11 = int_to_ptr.hbm [resolvable:$true] %s29_s11  ;;  %s32_s13 = int_to_ptr.vmem [resolvable:$true] %s31_s13 }
   0x2   :  { %s247_s15 = smov 8  }
   0x3   :  { %37 = dma.hbm_to_vmem [thread:$0]  %s30_s11, 2048, %s32_s13, [#allocation3], %s246_s14, %s246_s14, %s247_s15  }
   0x4   :  { %243 = dma.done.wait [#allocation3], 2048  }
   0x5   :  { %244 = vsyncadd [#allocation3], 4294965248  ;;  %vm54_vm0 = vcmask 64512   ;;  %v49_v0 = vld [vmem:[%s419_s1] sm:$0xff]  ;;  %v95_v2 = vld [vmem:[%s421_s3 + $0x78] sm:$0xff]  ;;  %vm204_vm1 = vcmask 15360  }
   0x6   :  { %v48_v1 = vld [vmem:[%s418_s0] sm:$0xff]  ;;  %73 = vmatpush.msra.mxu0 %v49_v0  ;;  %100 = vmatpush.msra.mxu1 %v95_v2  ;;  %v94_v3 = vld [vmem:[%s421_s3 + $0x70] sm:$0xff]  ;;  %v93_v4 = vld [vmem:[%s421_s3 + $0x68] sm:$0xff] }
   0x7   :  { %211 = vmatmul.msk.f32.vlgmr.msra.gmra.mxu0 %vm54_vm0, %v48_v1  ;;  %v92_v5 = vld [vmem:[%s421_s3 + $0x60] sm:$0xff]  ;;  %v91_v6 = vld [vmem:[%s421_s3 + $0x58] sm:$0xff]  ;;  %v90_v7 = vld [vmem:[%s421_s3 + $0x50] sm:$0xff] }
   0x8   :  { %101 = vmatpush.msra.mxu1 %v94_v3  ;;  %v89_v8 = vld [vmem:[%s421_s3 + $0x48] sm:$0xff]  ;;  %v88_v9 = vld [vmem:[%s421_s3 + $0x40] sm:$0xff]  ;;  %v87_v10 = vld [vmem:[%s421_s3 + $0x38] sm:$0xff] }
   0x9   :  { %v86_v11 = vld [vmem:[%s421_s3 + $0x30] sm:$0xff]  ;;  %v85_v12 = vld [vmem:[%s421_s3 + $0x28] sm:$0xff]  ;;  %v84_v13 = vld [vmem:[%s421_s3 + $0x20] sm:$0xff] }
   0xa   :  { %102 = vmatpush.msra.mxu1 %v93_v4  ;;  %v83_v14 = vld [vmem:[%s421_s3 + $0x18] sm:$0xff]  ;;  %v82_v15 = vld [vmem:[%s421_s3 + $0x10] sm:$0xff]  ;;  %v81_v16 = vld [vmem:[%s421_s3 + $0x8] sm:$0xff] }
   0xb   :  { %v80_v17 = vld [vmem:[%s421_s3] sm:$0xff]  ;;  %v137_v18 = vld [vmem:[#allocation2 + $0x78] sm:$0xff]  ;;  %v136_v19 = vld [vmem:[#allocation2 + $0x70] sm:$0xff] }
   0xc   :  { %103 = vmatpush.msra.mxu1 %v92_v5  ;;  %142 = vmatpush.msra.mxu2 %v137_v18  ;;  %v135_v20 = vld [vmem:[#allocation2 + $0x68] sm:$0xff]  ;;  %v134_v21 = vld [vmem:[#allocation2 + $0x60] sm:$0xff]  ;;  %v133_v22 = vld [vmem:[#allocation2 + $0x58] sm:$0xff] }
   0xd   :  { %v132_v23 = vld [vmem:[#allocation2 + $0x50] sm:$0xff]  ;;  %v131_v24 = vld [vmem:[#allocation2 + $0x48] sm:$0xff]  ;;  %v130_v25 = vld [vmem:[#allocation2 + $0x40] sm:$0xff] }
   0xe   :  { %104 = vmatpush.msra.mxu1 %v91_v6  ;;  %143 = vmatpush.msra.mxu2 %v136_v19  ;;  %v129_v26 = vld [vmem:[#allocation2 + $0x38] sm:$0xff]  ;;  %v128_v27 = vld [vmem:[#allocation2 + $0x30] sm:$0xff]  ;;  %v127_v28 = vld [vmem:[#allocation2 + $0x28] sm:$0xff] }
   0xf   :  { %v126_v29 = vld [vmem:[#allocation2 + $0x20] sm:$0xff]  ;;  %v125_v35 = vld [vmem:[#allocation2 + $0x18] sm:$0xff]  ;;  %v124_v36 = vld [vmem:[#allocation2 + $0x10] sm:$0xff] }
  0x10   :  { %105 = vmatpush.msra.mxu1 %v90_v7  ;;  %144 = vmatpush.msra.mxu2 %v135_v20  ;;  %v215_v30 = vld [vmem:[%s420_s2] ss:$0 sm:$0xff]  ;;  %v123_v37 = vld [vmem:[#allocation2 + $0x8] sm:$0xff]  ;;  %v179_v39 = vld [vmem:[%s425_s7 + $0x78] sm:$0xff] }
  0x11   :  { %v122_v38 = vld [vmem:[#allocation2] sm:$0xff]  ;;  %v178_v40 = vld [vmem:[%s425_s7 + $0x70] sm:$0xff]  ;;  %184 = vmatpush.msra.mxu3 %v179_v39  ;;  %v177_v41 = vld [vmem:[%s425_s7 + $0x68] sm:$0xff] }
  0x12   :  { %106 = vmatpush.msra.mxu1 %v89_v8  ;;  %145 = vmatpush.msra.mxu2 %v134_v21  ;;  %v176_v42 = vld [vmem:[%s425_s7 + $0x60] sm:$0xff]  ;;  %v175_v43 = vld [vmem:[%s425_s7 + $0x58] sm:$0xff]  ;;  %v174_v44 = vld [vmem:[%s425_s7 + $0x50] sm:$0xff] }
  0x13   :  { %185 = vmatpush.msra.mxu3 %v178_v40  ;;  %v173_v45 = vld [vmem:[%s425_s7 + $0x48] sm:$0xff]  ;;  %v172_v46 = vld [vmem:[%s425_s7 + $0x40] sm:$0xff]  ;;  %v171_v47 = vld [vmem:[%s425_s7 + $0x38] sm:$0xff] }
  0x14   :  { %107 = vmatpush.msra.mxu1 %v88_v9  ;;  %146 = vmatpush.msra.mxu2 %v133_v22  ;;  %v170_v48 = vld [vmem:[%s425_s7 + $0x30] sm:$0xff]  ;;  %v169_v49 = vld [vmem:[%s425_s7 + $0x28] sm:$0xff]  ;;  %v168_v50 = vld [vmem:[%s425_s7 + $0x20] sm:$0xff] }
  0x15   :  { %186 = vmatpush.msra.mxu3 %v177_v41  ;;  %v216_v51 = vld [vmem:[%s422_s4] ss:$0 sm:$0xff]  ;;  %v167_v56 = vld [vmem:[%s425_s7 + $0x18] sm:$0xff]  ;;  %v166_v57 = vld [vmem:[%s425_s7 + $0x10] sm:$0xff] }
  0x16   :  { %108 = vmatpush.msra.mxu1 %v87_v10  ;;  %147 = vmatpush.msra.mxu2 %v132_v23  ;;  %v165_v58 = vld [vmem:[%s425_s7 + $0x8] sm:$0xff]  ;;  %v164_v59 = vld [vmem:[%s425_s7] sm:$0xff] }
  0x17   :  { %187 = vmatpush.msra.mxu3 %v176_v42  ;;  %v217_v60 = vld [vmem:[%s424_s6] ss:$0 sm:$0xff] }
  0x18   :  { %109 = vmatpush.msra.mxu1 %v86_v11  ;;  %148 = vmatpush.msra.mxu2 %v131_v24  ;;  %v218_v1 = vld [vmem:[%s426_s8] ss:$0 sm:$0xff] }
  0x19   :  { %188 = vmatpush.msra.mxu3 %v175_v43 }
  0x1a   :  { %110 = vmatpush.msra.mxu1 %v85_v12  ;;  %149 = vmatpush.msra.mxu2 %v130_v25 }
  0x1b   :  { %189 = vmatpush.msra.mxu3 %v174_v44 }
  0x1c   :  { %111 = vmatpush.msra.mxu1 %v84_v13  ;;  %150 = vmatpush.msra.mxu2 %v129_v26 }
  0x1d   :  { %190 = vmatpush.msra.mxu3 %v173_v45 }
  0x1e   :  { %112 = vmatpush.msra.mxu1 %v83_v14  ;;  %151 = vmatpush.msra.mxu2 %v128_v27 }
  0x1f   :  { %191 = vmatpush.msra.mxu3 %v172_v46 }
  0x20   :  { %113 = vmatpush.msra.mxu1 %v82_v15  ;;  %152 = vmatpush.msra.mxu2 %v127_v28 }
  0x21   :  { %192 = vmatpush.msra.mxu3 %v171_v47 }
  0x22   :  { %114 = vmatpush.msra.mxu1 %v81_v16  ;;  %153 = vmatpush.msra.mxu2 %v126_v29 }
  0x23   :  { %193 = vmatpush.msra.mxu3 %v170_v48 }
  0x24   :  { %115 = vmatpush.msra.mxu1 %v80_v17  ;;  %154 = vmatpush.msra.mxu2 %v125_v35 }
  0x25   :  { %194 = vmatpush.msra.mxu3 %v169_v49 }
  0x26   :  { %155 = vmatpush.msra.mxu2 %v124_v36 }
  0x27   :  { %195 = vmatpush.msra.mxu3 %v168_v50 }
  0x28   :  { %156 = vmatpush.msra.mxu2 %v123_v37 }
  0x29   :  { %196 = vmatpush.msra.mxu3 %v167_v56 }
  0x2a   :  { %157 = vmatpush.msra.mxu2 %v122_v38 }
  0x2b   :  { %197 = vmatpush.msra.mxu3 %v166_v57 }
  0x2d   :  { %198 = vmatpush.msra.mxu3 %v165_v58 }
  0x2f   :  { %199 = vmatpush.msra.mxu3 %v164_v59 }
  0x84   :  { %v75_v31 = vpop.f32.mrf.mxu0 }
  0x85   :  { %v76_v32 = vadd.f32 %v215_v30, %v75_v31 }
  0x87   :  { %v78_v33 = vmul.f32 0.01, %v76_v32 }
  0x89   :  { %v79_v34 = vmax.f32 %v76_v32, %v78_v33 }
  0x8b   :  { %116 = vmatmul.f32.vlgmr.msra.gmra.mxu1 %v79_v34 }
 0x108   :  { %v117_v52 = vpop.f32.mrf.mxu1 }
 0x109   :  { %v118_v53 = vadd.f32 %v216_v51, %v117_v52 }
 0x10b   :  { %v120_v54 = vmul.f32 0.01, %v118_v53 }
 0x10d   :  { %v121_v55 = vmax.f32 %v118_v53, %v120_v54 }
 0x10f   :  { %158 = vmatmul.f32.vlgmr.msra.gmra.mxu2 %v121_v55 }
 0x192   :  { %v159_v61 = vpop.f32.mrf.mxu2 }
 0x193   :  { %v160_v62 = vadd.f32 %v217_v60, %v159_v61 }
 0x195   :  { %v162_v63 = vmul.f32 0.01, %v160_v62 }
 0x197   :  { %v163_v0 = vmax.f32 %v160_v62, %v162_v63 }
 0x199   :  { %200 = vmatmul.f32.vlgmr.msra.gmra.mxu3 %v163_v0 }
 0x21c   :  { %v201_v2 = vpop.f32.mrf.mxu3 }
 0x21d   :  { %v202_v3 = vadd.f32 %v218_v1, %v201_v2 }
 0x21f   :  { %205 = vst.msk [vmem:[%s427_s9] sm:$0xff] %vm204_vm1, %v202_v3 }
 0x220   :  { %210 = vsyncpa [#allocation3], 1 }

</bundles_post_ra>
